<compile_context>
chip_gen: v7x
topology: tpu7x:2x2x1
jax: 0.10.0
libtpu: 0.0.40
codegen_flags: <defaults>
</compile_context>

<pallas_src>
import math

import jax
import jax.numpy as jnp
import numpy as np
from jax import lax
from jax.experimental import pallas as pl
from jax.experimental.pallas import tpu as pltpu

_SQRT_HALF = 0.7071067811865476
_LN_EPS = 1e-5
_HALO_G = 16          # halo block rows (input groups); keeps blocks sublane-aligned


def _round_up(a, m):
    return -(-a // m) * m


def _cdiv(a, b):
    return -(-a // b)


# ----------------------------------------------------------------------------
# In-kernel math helpers
# ----------------------------------------------------------------------------
def _erf(z):
    # Abramowitz & Stegun 7.1.26 rational approximation (~1.5e-7 abs err).
    # The divide goes to the EUP slot via pl.reciprocal; the rest is pure VPU.
    a1, a2, a3, a4, a5 = 0.254829592, -0.284496736, 1.421413741, -1.453152027, 1.061405429
    p = 0.3275911
    az = jnp.abs(z)
    t = pl.reciprocal(1.0 + p * az, approx=True)
    poly = ((((a5 * t + a4) * t + a3) * t + a2) * t + a1) * t
    y = 1.0 - poly * jnp.exp(-az * az)
    return jnp.where(z >= 0, y, -y)


def _gelu_exact(x):
    return 0.5 * x * (1.0 + _erf(x * _SQRT_HALF))


# ----------------------------------------------------------------------------
# Fused Conv1d + GELU (+ optional LayerNorm) kernel with in-VMEM im2col
# ----------------------------------------------------------------------------
def _make_conv_kernel(*, s, c_in, c_out, tail, tm, t_valid_out, with_ln):
    sc = s * c_in          # width of one stride group (lane dim of body/halo)
    overlap = tail > 0     # k > s -> last output row of the tile needs one halo group

    def kernel(*refs):
        i = 0
        body = refs[i][0]; i += 1                           # (tm, sc)   storage dtype
        halo = None
        if overlap:
            halo = refs[i][0]; i += 1                       # (_HALO_G, sc)
        w_body = refs[i][...]; i += 1                       # (sc, c_out)
        w_tail = None
        if overlap:
            w_tail = refs[i][...]; i += 1                   # (tail, c_out)
        b = refs[i][...]; i += 1                            # (1, c_out) f32
        if with_ln:
            g = refs[i][...]; beta = refs[i + 1][...]; i += 2
        o_ref = refs[i]                                     # (1, tm, c_out)

        # Conv as matmul with in-VMEM im2col:
        #   y[t] = x-group[t]                       @ W[:s*c_in]      (body)
        #        + x-group[t+1][:(k-s)*c_in]        @ W[s*c_in:]      (shifted rows)
        y = jnp.dot(body, w_body, preferred_element_type=jnp.float32)
        if overlap:
            nxt = jnp.concatenate([body[1:], halo[0:1]], axis=0)   # rows shifted by one group
            if tail != sc:
                nxt = nxt[:, :tail]
            y = y + jnp.dot(nxt, w_tail, preferred_element_type=jnp.float32)

        y = y + b.astype(jnp.float32)
        y = _gelu_exact(y)
        # TODO(synk): nn.Dropout(0.1) treated as identity (inference semantics).

        if with_ln:
            mean = jnp.mean(y, axis=-1, keepdims=True)
            yc = y - mean
            var = jnp.mean(yc * yc, axis=-1, keepdims=True)
            y = yc * lax.rsqrt(var + _LN_EPS) * g.astype(jnp.float32) + beta.astype(jnp.float32)

        # Zero rows beyond the valid output length so anything the next layer
        # touches through its (over-allocated) halo region stays harmless.
        rows = pl.program_id(1) * tm + lax.broadcasted_iota(jnp.int32, (tm, 1), 0)
        y = jnp.where(rows < t_valid_out, y, 0.0)
        o_ref[0] = y.astype(o_ref.dtype)

    return kernel


def conv_block(xg, w_mat, bias, *, k, s, c_in, c_out, tm, n_tiles,
               t_valid_out, out_rows, ln=None, act_dtype=jnp.float32):
    """xg: (B, G, s*c_in) stride-grouped input.  Returns (B, out_rows, c_out);
    rows [0, n_tiles*tm) are written (valid data in [0, t_valid_out), zeros after)."""
    B, G, sc = xg.shape
    kc = k * c_in
    tail = kc - sc
    overlap = tail > 0
    assert sc == s * c_in and tm % _HALO_G == 0
    assert n_tiles * tm <= G
    if overlap:
        assert G >= n_tiles * tm + _HALO_G

    kernel = _make_conv_kernel(s=s, c_in=c_in, c_out=c_out, tail=tail, tm=tm,
                               t_valid_out=t_valid_out, with_ln=ln is not None)

    in_specs = [pl.BlockSpec((1, tm, sc), lambda b, t: (b, t, 0))]
    inputs = [xg]
    if overlap:
        step = tm // _HALO_G
        in_specs.append(pl.BlockSpec((1, _HALO_G, sc), lambda b, t: (b, (t + 1) * step, 0)))
        inputs.append(xg)                                   # second view of the same array

    # Weight split (host side, free): first s taps / trailing (k - s) taps.
    # Constant index_map -> both stay VMEM-resident across the time tiles.
    in_specs.append(pl.BlockSpec((sc, c_out), lambda b, t: (0, 0)))
    inputs.append(w_mat[:sc])
    if overlap:
        in_specs.append(pl.BlockSpec((tail, c_out), lambda b, t: (0, 0)))
        inputs.append(w_mat[sc:])
    in_specs.append(pl.BlockSpec((1, c_out), lambda b, t: (0, 0)))
    inputs.append(bias.reshape(1, c_out).astype(jnp.float32))
    if ln is not None:
        gamma, beta = ln
        in_specs += [pl.BlockSpec((1, c_out), lambda b, t: (0, 0)),
                     pl.BlockSpec((1, c_out), lambda b, t: (0, 0))]
        inputs += [gamma.reshape(1, c_out).astype(jnp.float32),
                   beta.reshape(1, c_out).astype(jnp.float32)]

    # VMEM budget: double-buffered body/halo/output blocks + resident weights.
    in_b = xg.dtype.itemsize
    out_b = jnp.dtype(act_dtype).itemsize
    blk = tm * sc * in_b + (_HALO_G * sc * in_b if overlap else 0) + tm * c_out * out_b
    vmem_limit = int(min(max(4 * blk + kc * c_out * w_mat.dtype.itemsize + (2 << 20),
                             16 << 20), 48 << 20))

    return pl.pallas_call(
        kernel,
        out_shape=jax.ShapeDtypeStruct((B, out_rows, c_out), act_dtype),
        grid=(B, n_tiles),
        in_specs=in_specs,
        out_specs=pl.BlockSpec((1, tm, c_out), lambda b, t: (b, t, 0)),
        compiler_params=pltpu.CompilerParams(
            dimension_semantics=("parallel", "parallel"),
            vmem_limit_bytes=vmem_limit),
    )(*inputs)


# ----------------------------------------------------------------------------
# Full FeatureEncoder forward
# ----------------------------------------------------------------------------
def feature_encoder_forward(x, params, *, act_dtype=jnp.float32, tm=None):
    """x: (B, L) raw waveform -> (B, T_final, C), matching the PyTorch module
    (whose trailing transpose(1, 2) puts time before channels)."""
    B, L = x.shape
    convs = params["convs"]
    n_layers = len(convs)

    # ---- static per-layer plan: valid lengths, tiles, allocation sizes ----
    plans = []
    t_valid = L
    for cp in convs:
        c_out, c_in, k = cp["w"].shape
        s = cp["s"]
        assert k <= 2 * s, "in-kernel im2col assumes kernel_size <= 2*stride (true for wav2vec)"
        assert c_out % 128 == 0, "lane-dense kernels assume C_out % 128 == 0"
        t_out = (t_valid - k) // s + 1
        tmi = tm if tm is not None else min(512, t_out)
        tmi = max(_HALO_G, _round_up(tmi, _HALO_G))
        n_tiles = _cdiv(t_out, tmi)
        halo = _HALO_G if k > s else 0
        plans.append(dict(k=k, s=s, c_in=c_in, c_out=c_out, tm=tmi, n_tiles=n_tiles,
                          t_out_valid=t_out, groups_needed=n_tiles * tmi + halo))
        t_valid = t_out

    # Output rows each layer allocates so the next layer's (free) grouped reshape
    # and halo blocks stay in bounds with no extra HBM pad copy of the activation.
    for i, p in enumerate(plans):
        written = p["n_tiles"] * p["tm"]
        if i + 1 < n_layers:
            nxt = plans[i + 1]
            p["out_rows"] = nxt["s"] * max(nxt["groups_needed"], _cdiv(written, nxt["s"]))
        else:
            p["out_rows"] = written

    # ---- layer 0 input: pad the (tiny) waveform, group by stride (free reshape) ----
    p0 = plans[0]
    g0 = max(p0["groups_needed"], _cdiv(L, p0["s"]))
    h = jnp.pad(x, ((0, 0), (0, g0 * p0["s"] - L)))
    h = h.reshape(B, g0, p0["s"] * p0["c_in"])          # c_in == 1; waveform stays f32

    for i, (p, cp) in enumerate(zip(plans, convs)):
        k, s, c_in, c_out = p["k"], p["s"], p["c_in"], p["c_out"]
        if i > 0:
            # previous layer's out_rows were sized so this reshape is free & exact
            h = h.reshape(B, h.shape[1] // s, s * c_in)
        w_mat = jnp.transpose(cp["w"], (2, 1, 0)).reshape(k * c_in, c_out).astype(h.dtype)
        ln = (params["ln_gamma"], params["ln_beta"]) if i == 0 else None
        h = conv_block(h, w_mat, cp["b"], k=k, s=s, c_in=c_in, c_out=c_out,
                       tm=p["tm"], n_tiles=p["n_tiles"], t_valid_out=p["t_out_valid"],
                       out_rows=p["out_rows"], ln=ln, act_dtype=act_dtype)

    return h[:, :plans[-1]["t_out_valid"], :]


# ----------------------------------------------------------------------------
# Deterministic parameter init (mimics PyTorch Conv1d default U(-1/sqrt(fan_in), .))
# ----------------------------------------------------------------------------
def init_params(key, conv_cfg):
    params = {"convs": []}
    in_ch = 1
    for (c_out, k, s) in conv_cfg:
        key, kw, kb = jax.random.split(key, 3)
        bound = 1.0 / math.sqrt(in_ch * k)
        w = jax.random.uniform(kw, (c_out, in_ch, k), jnp.float32, -bound, bound)
        b = jax.random.uniform(kb, (c_out,), jnp.float32, -bound, bound)
        params["convs"].append({"w": w, "b": b, "k": k, "s": s})
        in_ch = c_out
    c0 = conv_cfg[0][0]
    params["ln_gamma"] = jnp.ones((c0,), jnp.float32)
    params["ln_beta"] = jnp.zeros((c0,), jnp.float32)
    return params


# ----------------------------------------------------------------------------
# Pure-JAX reference (independent of the kernels)
# ----------------------------------------------------------------------------
def reference_forward(x, params):
    h = x[:, :, None]
    for i, cp in enumerate(params["convs"]):
        w = jnp.transpose(cp["w"], (2, 1, 0))            # (K, C_in, C_out)
        h = jax.lax.conv_general_dilated(
            h, w, window_strides=(cp["s"],), padding="VALID",
            dimension_numbers=("NWC", "WIO", "NWC"),
            precision=lax.Precision.HIGHEST)
        h = h + cp["b"][None, None, :]
        h = jax.nn.gelu(h, approximate=False)            # exact erf GELU, like nn.GELU()
        if i == 0:
            mean = jnp.mean(h, axis=-1, keepdims=True)
            var = jnp.mean((h - mean) ** 2, axis=-1, keepdims=True)
            h = (h - mean) / jnp.sqrt(var + _LN_EPS) * params["ln_gamma"] + params["ln_beta"]
    return h


if __name__ == "__main__":
    key = jax.random.PRNGKey(0)
    key, kx = jax.random.split(key)

    # Small analog of the wav2vec conv stack: (C_out, kernel, stride); C_out is a
    # multiple of 128 so stores are lane-dense (real model uses 512).
    conv_cfg = [(128, 10, 5), (128, 3, 2), (128, 2, 2)]
    B, L = 2, 325                                        # -> T: 64 -> 31 -> 15

    params = init_params(key, conv_cfg)
    x = jax.random.normal(kx, (B, L), jnp.float32)

    ref = reference_forward(x, params)

    # f32 path (correctness): tm=16 to exercise the T-tiled grid at small sizes.
    out = feature_encoder_forward(x, params, act_dtype=jnp.float32, tm=16)
    out = jax.block_until_ready(out)
    assert out.shape == ref.shape, (out.shape, ref.shape)
    np.testing.assert_allclose(np.asarray(out), np.asarray(ref), rtol=2e-2, atol=2e-2)

    # bf16 storage path (memory-traffic optimization on v6e/v7x): f32 accumulation
    # and f32 GELU/LN inside the kernels; loose sanity tolerance for bf16 drift.
    out_bf16 = feature_encoder_forward(x, params, act_dtype=jnp.bfloat16, tm=16)
    out_bf16 = jax.block_until_ready(out_bf16)
    np.testing.assert_allclose(np.asarray(out_bf16.astype(jnp.float32)), np.asarray(ref),
                               rtol=2e-1, atol=2e-1)

    print("KERNEL_OK")
</pallas_src>

<mosaic_0001>
module attributes {stable_mosaic.version = 11 : i64} {
  func.func @kernel(%arg0: i32, %arg1: i32, %arg2: memref<1x16x5xf32, #tpu.memory_space<vmem>>, %arg3: memref<1x16x5xf32, #tpu.memory_space<vmem>>, %arg4: memref<5x128xf32, #tpu.memory_space<vmem>>, %arg5: memref<5x128xf32, #tpu.memory_space<vmem>>, %arg6: memref<1x128xf32, #tpu.memory_space<vmem>>, %arg7: memref<1x128xf32, #tpu.memory_space<vmem>>, %arg8: memref<1x128xf32, #tpu.memory_space<vmem>>, %arg9: memref<1x16x128xf32, #tpu.memory_space<vmem>>) attributes {dimension_semantics = [#tpu.dimension_semantics<parallel>, #tpu.dimension_semantics<parallel>], iteration_bounds = array<i64: 2, 4>, scalar_prefetch = 0 : i64, scratch_operands = 0 : i64, tpu.core_type = #tpu.core_type<tc>, window_params = [{transform_indices = @transform_0, window_bounds = array<i64: 1, 16, 5>}, {transform_indices = @transform_1, window_bounds = array<i64: 1, 16, 5>}, {pipeline_mode = #tpu.pipeline_mode<synchronous>, transform_indices = @transform_2, window_bounds = array<i64: 5, 128>}, {pipeline_mode = #tpu.pipeline_mode<synchronous>, transform_indices = @transform_3, window_bounds = array<i64: 5, 128>}, {pipeline_mode = #tpu.pipeline_mode<synchronous>, transform_indices = @transform_4, window_bounds = array<i64: 1, 128>}, {pipeline_mode = #tpu.pipeline_mode<synchronous>, transform_indices = @transform_5, window_bounds = array<i64: 1, 128>}, {pipeline_mode = #tpu.pipeline_mode<synchronous>, transform_indices = @transform_6, window_bounds = array<i64: 1, 128>}, {transform_indices = @transform_7, window_bounds = array<i64: 1, 16, 128>}]} {
    %c0 = arith.constant 0 : index
    %c0_0 = arith.constant 0 : index
    %c0_1 = arith.constant 0 : index
    %0 = vector.load %arg2[%c0, %c0_0, %c0_1] : memref<1x16x5xf32, #tpu.memory_space<vmem>>, vector<1x16x5xf32>
    %1 = vector.shape_cast %0 : vector<1x16x5xf32> to vector<16x5xf32>
    %c0_2 = arith.constant 0 : index
    %c0_3 = arith.constant 0 : index
    %c0_4 = arith.constant 0 : index
    %2 = vector.load %arg3[%c0_2, %c0_3, %c0_4] : memref<1x16x5xf32, #tpu.memory_space<vmem>>, vector<1x16x5xf32>
    %3 = vector.shape_cast %2 : vector<1x16x5xf32> to vector<16x5xf32>
    %c0_5 = arith.constant 0 : index
    %c0_6 = arith.constant 0 : index
    %4 = vector.load %arg4[%c0_5, %c0_6] : memref<5x128xf32, #tpu.memory_space<vmem>>, vector<5x128xf32>
    %c0_7 = arith.constant 0 : index
    %c0_8 = arith.constant 0 : index
    %5 = vector.load %arg5[%c0_7, %c0_8] : memref<5x128xf32, #tpu.memory_space<vmem>>, vector<5x128xf32>
    %c0_9 = arith.constant 0 : index
    %c0_10 = arith.constant 0 : index
    %6 = vector.load %arg6[%c0_9, %c0_10] : memref<1x128xf32, #tpu.memory_space<vmem>>, vector<1x128xf32>
    %c0_11 = arith.constant 0 : index
    %c0_12 = arith.constant 0 : index
    %7 = vector.load %arg7[%c0_11, %c0_12] : memref<1x128xf32, #tpu.memory_space<vmem>>, vector<1x128xf32>
    %c0_13 = arith.constant 0 : index
    %c0_14 = arith.constant 0 : index
    %8 = vector.load %arg8[%c0_13, %c0_14] : memref<1x128xf32, #tpu.memory_space<vmem>>, vector<1x128xf32>
    %cst = arith.constant dense<0.000000e+00> : vector<16x128xf32>
    %9 = tpu.matmul %1, %4, %cst {dimension_numbers = #tpu.dot_dimension_numbers<[1], [0], [0], [1], [0, 0, 1, 1], [], []>} : vector<16x5xf32>, vector<5x128xf32>, vector<16x128xf32> -> vector<16x128xf32>
    %10 = vector.extract_strided_slice %1 {offsets = [1, 0], sizes = [15, 5], strides = [1, 1]} : vector<16x5xf32> to vector<15x5xf32>
    %11 = vector.extract_strided_slice %3 {offsets = [0, 0], sizes = [1, 5], strides = [1, 1]} : vector<16x5xf32> to vector<1x5xf32>
    %12 = tpu.concatenate %10, %11 in 0 : vector<15x5xf32>, vector<1x5xf32> -> vector<16x5xf32>
    %cst_15 = arith.constant dense<0.000000e+00> : vector<16x128xf32>
    %13 = tpu.matmul %12, %5, %cst_15 {dimension_numbers = #tpu.dot_dimension_numbers<[1], [0], [0], [1], [0, 0, 1, 1], [], []>} : vector<16x5xf32>, vector<5x128xf32>, vector<16x128xf32> -> vector<16x128xf32>
    %14 = arith.addf %9, %13 : vector<16x128xf32>
    %15 = vector.broadcast %6 : vector<1x128xf32> to vector<16x128xf32>
    %16 = arith.addf %14, %15 : vector<16x128xf32>
    %cst_16 = arith.constant 5.000000e-01 : f32
    %17 = vector.broadcast %cst_16 : f32 to vector<16x128xf32>
    %18 = arith.mulf %17, %16 : vector<16x128xf32>
    %cst_17 = arith.constant 0.707106769 : f32
    %19 = vector.broadcast %cst_17 : f32 to vector<16x128xf32>
    %20 = arith.mulf %16, %19 : vector<16x128xf32>
    %21 = math.absf %20 : vector<16x128xf32>
    %cst_18 = arith.constant 0.327591091 : f32
    %22 = vector.broadcast %cst_18 : f32 to vector<16x128xf32>
    %23 = arith.mulf %22, %21 : vector<16x128xf32>
    %cst_19 = arith.constant 1.000000e+00 : f32
    %24 = vector.broadcast %cst_19 : f32 to vector<16x128xf32>
    %25 = arith.addf %24, %23 : vector<16x128xf32>
    %26 = tpu.reciprocal %25 {approx = true} : vector<16x128xf32> -> vector<16x128xf32>
    %cst_20 = arith.constant 1.06140542 : f32
    %27 = vector.broadcast %cst_20 : f32 to vector<16x128xf32>
    %28 = arith.mulf %27, %26 : vector<16x128xf32>
    %cst_21 = arith.constant -1.45315206 : f32
    %29 = vector.broadcast %cst_21 : f32 to vector<16x128xf32>
    %30 = arith.addf %28, %29 : vector<16x128xf32>
    %31 = arith.mulf %30, %26 : vector<16x128xf32>
    %cst_22 = arith.constant 1.42141378 : f32
    %32 = vector.broadcast %cst_22 : f32 to vector<16x128xf32>
    %33 = arith.addf %31, %32 : vector<16x128xf32>
    %34 = arith.mulf %33, %26 : vector<16x128xf32>
    %cst_23 = arith.constant -0.284496725 : f32
    %35 = vector.broadcast %cst_23 : f32 to vector<16x128xf32>
    %36 = arith.addf %34, %35 : vector<16x128xf32>
    %37 = arith.mulf %36, %26 : vector<16x128xf32>
    %cst_24 = arith.constant 0.254829586 : f32
    %38 = vector.broadcast %cst_24 : f32 to vector<16x128xf32>
    %39 = arith.addf %37, %38 : vector<16x128xf32>
    %40 = arith.mulf %39, %26 : vector<16x128xf32>
    %cst_25 = arith.constant 0.000000e+00 : f32
    %41 = vector.broadcast %cst_25 : f32 to vector<16x128xf32>
    %42 = arith.subf %41, %21 : vector<16x128xf32>
    %43 = arith.mulf %42, %21 : vector<16x128xf32>
    %44 = math.exp %43 : vector<16x128xf32>
    %45 = arith.mulf %40, %44 : vector<16x128xf32>
    %cst_26 = arith.constant 1.000000e+00 : f32
    %46 = vector.broadcast %cst_26 : f32 to vector<16x128xf32>
    %47 = arith.subf %46, %45 : vector<16x128xf32>
    %cst_27 = arith.constant 0.000000e+00 : f32
    %48 = vector.broadcast %cst_27 : f32 to vector<16x128xf32>
    %49 = arith.cmpf oge, %20, %48 : vector<16x128xf32>
    %cst_28 = arith.constant 0.000000e+00 : f32
    %50 = vector.broadcast %cst_28 : f32 to vector<16x128xf32>
    %51 = arith.subf %50, %47 : vector<16x128xf32>
    %52 = arith.select %49, %47, %51 : vector<16x128xi1>, vector<16x128xf32>
    %cst_29 = arith.constant 1.000000e+00 : f32
    %53 = vector.broadcast %cst_29 : f32 to vector<16x128xf32>
    %54 = arith.addf %53, %52 : vector<16x128xf32>
    %55 = arith.mulf %18, %54 : vector<16x128xf32>
    %cst_30 = arith.constant dense<0.000000e+00> : vector<16xf32>
    %56 = vector.multi_reduction <add>, %55, %cst_30 [1] : vector<16x128xf32> to vector<16xf32>
    %57 = vector.shape_cast %56 : vector<16xf32> to vector<16x1xf32>
    %cst_31 = arith.constant 1.280000e+02 : f32
    %58 = vector.broadcast %cst_31 : f32 to vector<16x1xf32>
    %59 = arith.divf %57, %58 : vector<16x1xf32>
    %60 = vector.broadcast %59 : vector<16x1xf32> to vector<16x128xf32>
    %61 = arith.subf %55, %60 : vector<16x128xf32>
    %62 = arith.mulf %61, %61 : vector<16x128xf32>
    %cst_32 = arith.constant dense<0.000000e+00> : vector<16xf32>
    %63 = vector.multi_reduction <add>, %62, %cst_32 [1] : vector<16x128xf32> to vector<16xf32>
    %64 = vector.shape_cast %63 : vector<16xf32> to vector<16x1xf32>
    %cst_33 = arith.constant 1.280000e+02 : f32
    %65 = vector.broadcast %cst_33 : f32 to vector<16x1xf32>
    %66 = arith.divf %64, %65 : vector<16x1xf32>
    %cst_34 = arith.constant 9.99999974E-6 : f32
    %67 = vector.broadcast %cst_34 : f32 to vector<16x1xf32>
    %68 = arith.addf %66, %67 : vector<16x1xf32>
    %69 = math.rsqrt %68 : vector<16x1xf32>
    %70 = vector.broadcast %69 : vector<16x1xf32> to vector<16x128xf32>
    %71 = arith.mulf %61, %70 : vector<16x128xf32>
    %72 = vector.broadcast %7 : vector<1x128xf32> to vector<16x128xf32>
    %73 = arith.mulf %71, %72 : vector<16x128xf32>
    %74 = vector.broadcast %8 : vector<1x128xf32> to vector<16x128xf32>
    %75 = arith.addf %73, %74 : vector<16x128xf32>
    %c16_i32 = arith.constant 16 : i32
    %76 = arith.muli %arg1, %c16_i32 : i32
    %77 = tpu.iota {dimensions = array<i32: 0>} : vector<16x1xi32>
    %78 = vector.broadcast %76 : i32 to vector<16x1xi32>
    %79 = arith.addi %78, %77 : vector<16x1xi32>
    %c64_i32 = arith.constant 64 : i32
    %80 = vector.broadcast %c64_i32 : i32 to vector<16x1xi32>
    %81 = arith.cmpi slt, %79, %80 : vector<16x1xi32>
    %cst_35 = arith.constant 0.000000e+00 : f32
    %82 = vector.shape_cast %81 : vector<16x1xi1> to vector<16x1xi1>
    %83 = vector.broadcast %82 : vector<16x1xi1> to vector<16x128xi1>
    %84 = vector.broadcast %cst_35 : f32 to vector<16x128xf32>
    %85 = arith.select %83, %75, %84 : vector<16x128xi1>, vector<16x128xf32>
    %c0_36 = arith.constant 0 : index
    %c0_37 = arith.constant 0 : index
    %c0_38 = arith.constant 0 : index
    %86 = vector.load %arg9[%c0_36, %c0_37, %c0_38] : memref<1x16x128xf32, #tpu.memory_space<vmem>>, vector<1x16x128xf32>
    %87 = vector.shape_cast %86 : vector<1x16x128xf32> to vector<16x128xf32>
    %88 = vector.shape_cast %85 : vector<16x128xf32> to vector<1x16x128xf32>
    tpu.vector_store %arg9[%c0_36, %c0_37, %c0_38], %88 {strides = array<i32>} : memref<1x16x128xf32, #tpu.memory_space<vmem>>, vector<1x16x128xf32>,
    return
  }
  func.func @transform_0(%arg0: i32, %arg1: i32) -> (i32, i32, i32) {
    %c0_i32 = arith.constant 0 : i32
    %c0_i32_0 = arith.constant 0 : i32
    return %arg0, %arg1, %c0_i32 : i32, i32, i32
  }
  func.func @transform_1(%arg0: i32, %arg1: i32) -> (i32, i32, i32) {
    %c1_i32 = arith.constant 1 : i32
    %0 = arith.addi %arg1, %c1_i32 : i32
    %c1_i32_0 = arith.constant 1 : i32
    %1 = arith.muli %0, %c1_i32_0 : i32
    %c0_i32 = arith.constant 0 : i32
    %c0_i32_1 = arith.constant 0 : i32
    return %arg0, %1, %c0_i32 : i32, i32, i32
  }
  func.func @transform_2(%arg0: i32, %arg1: i32) -> (i32, i32) {
    %c0_i32 = arith.constant 0 : i32
    %c0_i32_0 = arith.constant 0 : i32
    %c0_i32_1 = arith.constant 0 : i32
    return %c0_i32, %c0_i32_0 : i32, i32
  }
  func.func @transform_3(%arg0: i32, %arg1: i32) -> (i32, i32) {
    %c0_i32 = arith.constant 0 : i32
    %c0_i32_0 = arith.constant 0 : i32
    %c0_i32_1 = arith.constant 0 : i32
    return %c0_i32, %c0_i32_0 : i32, i32
  }
  func.func @transform_4(%arg0: i32, %arg1: i32) -> (i32, i32) {
    %c0_i32 = arith.constant 0 : i32
    %c0_i32_0 = arith.constant 0 : i32
    %c0_i32_1 = arith.constant 0 : i32
    return %c0_i32, %c0_i32_0 : i32, i32
  }
  func.func @transform_5(%arg0: i32, %arg1: i32) -> (i32, i32) {
    %c0_i32 = arith.constant 0 : i32
    %c0_i32_0 = arith.constant 0 : i32
    %c0_i32_1 = arith.constant 0 : i32
    return %c0_i32, %c0_i32_0 : i32, i32
  }
  func.func @transform_6(%arg0: i32, %arg1: i32) -> (i32, i32) {
    %c0_i32 = arith.constant 0 : i32
    %c0_i32_0 = arith.constant 0 : i32
    %c0_i32_1 = arith.constant 0 : i32
    return %c0_i32, %c0_i32_0 : i32, i32
  }
  func.func @transform_7(%arg0: i32, %arg1: i32) -> (i32, i32, i32) {
    %c0_i32 = arith.constant 0 : i32
    %c0_i32_0 = arith.constant 0 : i32
    return %arg0, %arg1, %c0_i32 : i32, i32, i32
  }
}

</mosaic_0001>

<bundles_post_ra>
// kernel: tpu_custom_call.1
= control target key start
LH: loop header
LB: loop body
LE: loop exit
PB: predicated region body
PF: predicated region fallthrough
CT: control target
= control target key end

     0   :  { %s1207_s0 = inlined_call_operand.vmem [shape: f32[2,80,5], index: 0, kind: input, shape index: {}]   ;;  %s1208_s1 = inlined_call_operand.vmem [shape: f32[2,80,5], index: 1, kind: input, shape index: {}]   ;;  %s1209_s2 = inlined_call_operand.vmem [shape: f32[5,128], index: 2, kind: input, shape index: {}]   ;;  %s1210_s3 = inlined_call_operand.vmem [shape: f32[5,128], index: 3, kind: input, shape index: {}]   ;;  %s1211_s4 = inlined_call_operand.vmem [shape: f32[1,128], index: 4, kind: input, shape index: {}]   ;;  %s1212_s5 = inlined_call_operand.vmem [shape: f32[1,128], index: 5, kind: input, shape index: {}]   ;;  %s1213_s6 = inlined_call_operand.vmem [shape: f32[1,128], index: 6, kind: input, shape index: {}]   ;;  %s1214_s7 = inlined_call_operand.hbm [shape: f32[2,96,128], index: 7, kind: output, shape index: {}]  }
   0x1   :  { %1215 = sst [smem:[#allocation5_spill]] %s1209_s2 }
   0x2   :  { %1216 = sst [smem:[#allocation6_spill]] %s1210_s3 }
   0x3   :  { %12 = vsyncpa [#allocation3], 0 }
   0x4   :  { %14 = vsyncpa [#allocation3 + $0x1], 0  ;;  %s1040_s24 = smov 0   ;;  %s1042_s25 = smov 0  }
   0x5   :  { %s1044_s26 = smov 0   ;;  %s1046_s27 = smov 0  }
   0x6   :  { %s1048_s28 = smov 0   ;;  %s1050_s29 = smov 0  }
   0x7   :  { %s1052_s30 = smov 0   ;;  %s1054_s8 = smov 0  }
   0x8 LB: > { %s769_s9 = sadd.s32 4294967295, %s995_s8   ;;  %s770_s10 = sadd.s32 4294967294, %s995_s8   ;;  %s995_s8 = sphi %s1054_s8, %s20_s8   ;;  %s991_s30 = sphi %s1052_s30, %s1227_s30   ;;  %s987_s29 = sphi %s1050_s29, %s1226_s29   ;;  %s983_s28 = sphi %s1048_s28, %s1225_s28   ;;  %s979_s27 = sphi %s1046_s27, %s1224_s27   ;;  %s975_s26 = sphi %s1044_s26, %s1223_s26   ;;  %s971_s25 = sphi %s1042_s25, %s1222_s25   ;;  %s967_s24 = sphi %s1040_s24, %s1221_s24  }
   0x9   : > { %s29_s11 = sadd.s32 1, %s987_s29  ;;  %s32_s12 = sadd.s32 1, %s991_s30 }
   0xa   : > { %p30_p0 = scmp.ge.s32.totalorder %s29_s11, 4  ;;  %p214_p1 = scmp.ne.s32.totalorder %s975_s26, %s971_s25 }
   0xb   : > { %p215_p2 = scmp.eq.s32.totalorder %s769_s9, 7  ;;  %p220_p5 = scmp.ne.s32.totalorder %s971_s25, %s967_s24 }
   0xc   : > { %s1229_s11 = smov (%p30_p0, %s29_s11), 0  ;;  %s1231_s12 = smov (!%p30_p0, %s32_s12), %s991_s30 }
   0xd   : > { %s200_s13 = ssub.s32 %s987_s29, %s1229_s11  ;;  %p1091_p3 = por %p215_p2, %p214_p1 }
   0xe   : > { %p34_p4 = scmp.ge.s32.totalorder %s1231_s12, 2  ;;  %p221_p6 = scmp.eq.s32.totalorder %s770_s10, 7 }
   0xf   : > { %p773_p7 = scmp.ge.s32.totalorder %s995_s8, 1  ;;  %p282_p9 = scmp.lt.s32.totalorder %s995_s8, 9 }
  0x10   : > { %s1233_s12 = smov (%p34_p4, %s1231_s12), 0  ;;  %p1100_p8 = por %p221_p6, %p220_p5 }
  0x11   : > { %s199_s16 = ssub.s32 %s991_s30, %s1233_s12  ;;  %s204_s17 = sadd.s32 1, %s975_s26 }
  0x12   : > { %s201_s18 = sor.u32 %s200_s13, %s199_s16  ;;  %p283_p10 = pnand %p773_p7, %p282_p9 }
  0x13   : > { %p202_p11 = scmp.eq.s32.totalorder %s201_s18, 0  ;;  %s1219_s2 = sld [smem:[#allocation5_spill]] (!%p283_p10)  ;;  %vm376_vm0 = vcmask (!%p283_p10), 1044480   ;;  %vm370_vm1 = vcmask (!%p283_p10), 39936   ;;  %vm361_vm2 = vcmask (!%p283_p10), 1046528  }
  0x14   : > { %286 = sbr.rel (%p283_p10) target bundleno = 635 (0x27b), region = 48  ;;  %s1220_s3 = sld [smem:[#allocation6_spill]] (!%p283_p10)  ;;  %v785_v12 = vld [vmem:[%s1211_s4] ss:$0 sm:$0xff] (!%p283_p10) }
  0x15   : > { %s1109_s19 = scalar_select %p202_p11, %s975_s26, %s204_s17  }
  0x16   : > { %s1118_s9 = sshll.u32 (!%p283_p10), %s979_s27, 1  ;;  %p329_p12 = scmp.lt.s32.totalorder (!%p283_p10), %s983_s28, 1 }
  0x17   : > { %p331_p13 = scmp.lt.s32.totalorder (!%p283_p10), %s1118_s9, 9  ;;  %s795_s10 = sadd.s32 (!%p283_p10), 2, %s1118_s9 }
  0x18   : > { %p342_p0 = scmp.lt.s32.totalorder (!%p283_p10), %s795_s10, 9  ;;  %s997_s22 = smov (!%p283_p10), [#allocation2]  }
  0x19   : > { %v354_v0 = vld [vmem:[%s1219_s2] sm:$0x1f] (!%p283_p10) }
  0x1a   : > { %v355_v1 = vld [vmem:[%s1220_s3] sm:$0x1f] (!%p283_p10)  ;;  %807 = vmatprep.subr.msk.mxu0 (!%p283_p10), %vm376_vm0, %v354_v0 }
  0x1b   : > { %802 = vmatprep.subr.msk.mxu1 %vm376_vm0, %v355_v1  ;;  %808 = vmatpush3.msk.msra.mxu0 %vm376_vm0, %v354_v0  ;;  %s330_s13 = scalar_select %p329_p12, %s983_s28, 1 }
  0x1c   : > { %803 = vmatpush3.msk.msra.mxu1 %vm376_vm0, %v355_v1  ;;  %s332_s16 = scalar_select %p331_p13, %s1118_s9, 9 }
  0x1d   : > { %s814_s17 = smul.u32 10, %s330_s13  ;;  %s1235_s10 = smov (!%p342_p0, %s795_s10), 9 }
  0x1f   : > { %s334_s18 = sadd.s32 %s814_s17, %s332_s16  ;;  %s345_s2 = sadd.s32 %s814_s17, %s1235_s10 }
  0x20   : > { %s776_s20 = sshll.u32 %s334_s18, 3  ;;  %s778_s13 = sshll.u32 %s345_s2, 3 }
  0x21   : > { %s336_s23 = scalar_lea.vmem %s1207_s0, %s776_s20  ;;  %s347_s3 = scalar_lea.vmem %s1208_s1, %s778_s13 }
  0x22   : > { %v351_v2 = vld [vmem:[%s336_s23] sm:$0xff]  ;;  %v352_v3 = vld [vmem:[%s336_s23 + $0x8] sm:$0xff]  ;;  %s788_s2 = sshll.u32 %s979_s27, 4  ;;  %s325_s10 = sand.u32 1, %s971_s25  }
  0x23   : > { %v362_v4 = vrot.slane %v351_v2, 1  ;;  %v363_v5 = vrot.slane %v352_v3, 1  ;;  %809 = vmatprep.mubr.msk.f32.mxu0 %vm370_vm1, %v351_v2  ;;  %v353_v7 = vld [vmem:[%s347_s3] sm:$0xff]  ;;  %s815_s3 = smul.u32 12, %s983_s28  ;;  %s774_s23 = sshll.u32 %s325_s10, 4 }
  0x24   : > { %810 = vmatmul.mubr.msk.f32.vlgmr.msra.gmra.mrb[0].mxu0 %vm370_vm1, %v352_v3  ;;  %v367_v8 = vrot.slane %v353_v7, 1  ;;  %s327_s28 = scalar_lea.vmem [#allocation2], %s774_s23  ;;  %s905_s23 = sshll.u32 %s997_s22, 4  ;;  %s906_s23 = int_to_ptr.vmem [resolvable:$false] %s905_s23 }
  0x25   : > { %v364_v6 = vsel %vm361_vm2, %v362_v4, %v363_v5  ;;  %s666_s18 = sadd.s32 %s815_s3, %s1118_s9  ;;  %s669_s20 = sshll.u32 %s327_s28, 4  ;;  %s1153_s20 = int_to_ptr.vmem [resolvable:$true] %s669_s20 }
  0x26   : > { %804 = vmatprep.mubr.msk.f32.mxu1 %vm370_vm1, %v364_v6  ;;  %v369_v9 = vsel %vm361_vm2, %v363_v5, %v367_v8  ;;  %s791_s27 = sshll.u32 %s666_s18, 7  ;;  %s1155_s9 = scalar_lea.sflag [#allocation3], %s325_s10 }
  0x27   : > { %805 = vmatmul.mubr.msk.f32.vlgmr.msra.gmra.mrb[0].mxu1 %vm370_vm1, %v369_v9  ;;  %s1151_s17 = scalar_lea.hbm %s1214_s7, %s791_s27  ;;  %s901_s3 = scalar_lea.vmem %s1153_s20, 256 }
  0x28   : > { %p902_p1 = scmp.ne.s32.totalorder %s1153_s20, %s901_s3  ;;  %s907_s13 = scalar_lea.vmem %s906_s23, 512 }
  0x29   : > { %p908_p5 = scmp.lt.s32.totalorder %s1153_s20, %s906_s23  ;;  %p909_p6 = scmp.lt.s32.totalorder %s907_s13, %s901_s3 }
  0x2a   : > { %p903_p2 = pnand %p902_p1, %p1091_p3 }
  0x2b   : > { %p910_p7 = por %p909_p6, %p908_p5 }
  0x2c   : > { %p904_p4 = pneg %p903_p2 }
  0x2e   : > { %p911_p9 = pnand %p910_p7, %p904_p4 }
  0xf7   : > { %v811_v10 = vpop.f32.mrb[0].mxu0 }
  0xf8   : > { %v528_v11 = vpop.f32.mrb[1].mxu0 }
  0xfa   : > { %v806_v13 = vpop.f32.mrb[0].mxu1 }
  0xfb   : > { %v534_v14 = vadd.f32 %v811_v10, %v806_v13  ;;  %v446_v15 = vpop.f32.mrb[1].mxu1 }
  0xfc   : > { %v529_v16 = vadd.f32 %v528_v11, %v446_v15 }
  0xfd   : > { %v544_v17 = vadd.f32 %v785_v12, %v534_v14 }
  0xfe   : > { %v543_v18 = vadd.f32 %v785_v12, %v529_v16 }
  0xff   : > { %v548_v19 = vmul.f32 0.70710677, %v544_v17  ;;  %v546_v3 = vmul.f32 0.5, %v544_v17 }
 0x100   : > { %v547_v20 = vmul.f32 0.70710677, %v543_v18  ;;  %v545_v63 = vmul.f32 0.5, %v543_v18 }
 0x101   : > { %v550_v21 = vand.u32 2147483647, %v548_v19  ;;  %vm588_vm4 = vcmp.ge.f32.partialorder %v548_v19, 0.0  ;;  %v637_v19 = vlaneseq }
 0x102   : > { %v549_v22 = vand.u32 2147483647, %v547_v20  ;;  %vm587_vm3 = vcmp.ge.f32.partialorder %v547_v20, 0.0 }
 0x103   : > { %v552_v23 = vmul.f32 0.3275911, %v550_v21  ;;  %v576_v27 = vsub.f32 0.0, %v550_v21  ;;  %v638_v20 = vshrl.u32 %v637_v19, 7 }
 0x104   : > { %v551_v24 = vmul.f32 0.3275911, %v549_v22  ;;  %v575_v28 = vsub.f32 0.0, %v549_v22 }
 0x105   : > { %v554_v25 = vadd.f32 1.0, %v552_v23  ;;  %v578_v30 = vmul.f32 %v576_v27, %v550_v21  ;;  %v640_v21 = vstv %s788_s2  ;;  %v786_v23 = vld [vmem:[%s1212_s5] ss:$0 sm:$0xff] }
 0x106   : > { %v553_v26 = vadd.f32 1.0, %v551_v24  ;;  %v577_v32 = vmul.f32 %v575_v28, %v549_v22  ;;  %v639_v24 = vadd.s32 8, %v638_v20  ;;  %v787_v27 = vld [vmem:[%s1213_s6] ss:$0 sm:$0xff] }
 0x107   : > { %889 = vrcp.f32 %v554_v25  ;;  %v581_v36 = vmul.f32 1.442695, %v578_v30  ;;  %v641_v25 = vadd.s32 %v640_v21, %v638_v20 }
 0x108   : > { %891 = vrcp.f32 %v553_v26  ;;  %v579_v38 = vmul.f32 1.442695, %v577_v32  ;;  %v642_v30 = vadd.s32 %v640_v21, %v639_v24 }
 0x109   : > { %893 = vpow2.f32 %v581_v36  ;;  %vm643_vm5 = vcmp.lt.s32.totalorder %v641_v25, 64 }
 0x10a   : > { %895 = vpow2.f32 %v579_v38  ;;  %vm644_vm6 = vcmp.lt.s32.totalorder %v642_v30, 64 }
 0x111   : > { %v890_v29 = vpop.eup %889 }
 0x112   : > { %v892_v31 = vpop.eup %891  ;;  %v558_v33 = vmul.f32 1.0614054, %v890_v29 }
 0x113   : > { %v557_v34 = vmul.f32 1.0614054, %v892_v31  ;;  %v894_v52 = vpop.eup %893 }
 0x114   : > { %v560_v35 = vadd.f32 -1.4531521, %v558_v33  ;;  %v896_v54 = vpop.eup %895 }
 0x115   : > { %v559_v37 = vadd.f32 -1.4531521, %v557_v34 }
 0x116   : > { %v562_v39 = vmul.f32 %v890_v29, %v560_v35 }
 0x117   : > { %v561_v40 = vmul.f32 %v892_v31, %v559_v37 }
 0x118   : > { %v564_v41 = vadd.f32 1.4214138, %v562_v39 }
 0x119   : > { %v563_v42 = vadd.f32 1.4214138, %v561_v40 }
 0x11a   : > { %v566_v43 = vmul.f32 %v890_v29, %v564_v41 }
 0x11b   : > { %v565_v44 = vmul.f32 %v892_v31, %v563_v42 }
 0x11c   : > { %v568_v45 = vadd.f32 -0.28449672, %v566_v43 }
 0x11d   : > { %v567_v46 = vadd.f32 -0.28449672, %v565_v44 }
 0x11e   : > { %v570_v47 = vmul.f32 %v890_v29, %v568_v45 }
 0x11f   : > { %v569_v48 = vmul.f32 %v892_v31, %v567_v46 }
 0x120   : > { %v572_v49 = vadd.f32 0.2548296, %v570_v47 }
 0x121   : > { %v571_v50 = vadd.f32 0.2548296, %v569_v48 }
 0x122   : > { %v574_v51 = vmul.f32 %v890_v29, %v572_v49 }
 0x123   : > { %v573_v53 = vmul.f32 %v892_v31, %v571_v50 }
 0x124   : > { %v584_v55 = vmul.f32 %v894_v52, %v574_v51 }
 0x125   : > { %v583_v56 = vmul.f32 %v896_v54, %v573_v53 }
 0x126   : > { %v586_v57 = vsub.f32 1.0, %v584_v55 }
 0x127   : > { %v585_v58 = vsub.f32 1.0, %v583_v56 }
 0x128   : > { %v590_v59 = vsub.f32 0.0, %v586_v57 }
 0x129   : > { %v589_v60 = vsub.f32 0.0, %v585_v58 }
 0x12a   : > { %v592_v62 = vsel %vm588_vm4, %v586_v57, %v590_v59 }
 0x12b   : > { %v591_v61 = vsel %vm587_vm3, %v585_v58, %v589_v60  ;;  %v594_v2 = vadd.f32 1.0, %v592_v62 }
 0x12c   : > { %v593_v0 = vadd.f32 1.0, %v591_v61 }
 0x12d   : > { %v596_v4 = vmul.f32 %v594_v2, %v546_v3 }
 0x12e   : > { %v595_v1 = vmul.f32 %v593_v0, %v545_v63 }
 0x130   : > { %597 = vadd.xlane.f32.xlu0 %v595_v1 }
 0x134   : > { %599 = vadd.xlane.f32.xlu0 %v596_v4 }
 0x1bd   : > { %v598_v5 = vpop.xlane.xlu0 %597 }
 0x1be   : > { %v602_v6 = vmul.f32 0.0078125, %v598_v5 }
 0x1c0   : > { %v604_v7 = vsub.f32 %v595_v1, %v602_v6 }
 0x1c1   : > { %v600_v8 = vpop.xlane.xlu0 %599 }
 0x1c2   : > { %v603_v9 = vmul.f32 0.0078125, %v600_v8  ;;  %v606_v10 = vmul.f32 %v604_v7, %v604_v7 }
 0x1c4   : > { %v605_v11 = vsub.f32 %v596_v4, %v603_v9  ;;  %608 = vadd.xlane.f32.xlu1 %v606_v10 }
 0x1c6   : > { %v607_v12 = vmul.f32 %v605_v11, %v605_v11 }
 0x1c8   : > { %610 = vadd.xlane.f32.xlu1 %v607_v12 }
 0x251   : > { %v609_v13 = vpop.xlane.xlu1 %608 }
 0x252   : > { %v612_v14 = vmul.f32 0.0078125, %v609_v13 }
 0x254   : > { %v614_v15 = vadd.f32 1e-05, %v612_v14 }
 0x255   : > { %v611_v16 = vpop.xlane.xlu1 %610 }
 0x256   : > { %897 = vrsqrt.f32 %v614_v15  ;;  %v613_v17 = vmul.f32 0.0078125, %v611_v16 }
 0x258   : > { %v615_v18 = vadd.f32 1e-05, %v613_v17 }
 0x25a   : > { %899 = vrsqrt.f32 %v615_v18 }
 0x260   : > { %v898_v22 = vpop.eup %897 }
 0x261   : > { %v618_v26 = vmul.f32 %v898_v22, %v604_v7 }
 0x263   : > { %v626_v28 = vmul.f32 %v786_v23, %v618_v26 }
 0x264   : > { %v900_v29 = vpop.eup %899 }
 0x265   : > { %v619_v31 = vmul.f32 %v900_v29, %v605_v11  ;;  %v634_v32 = vadd.f32 %v787_v27, %v626_v28 }
 0x267   : > { %v627_v33 = vmul.f32 %v786_v23, %v619_v31  ;;  %v649_v34 = vsel %vm643_vm5, %v634_v32, 0.0 }
 0x268   : > { %651 = vst [vmem:[%s327_s28] sm:$0xff] %v649_v34 }
 0x269   : > { %v635_v35 = vadd.f32 %v787_v27, %v627_v33 }
 0x26b   : > { %v650_v36 = vsel %vm644_vm6, %v635_v35, 0.0 }
 0x26c   : > { %652 = vst [vmem:[%s327_s28 + $0x8] sm:$0xff] %v650_v36 }
 0x26d   : > { %914 = shalt.err (!%p911_p9)
}
 0x26e   : > { %s915_s10 = scalar_lea.hbm %s1151_s17, 256  ;;  %s919_s27 = scalar_lea.hbm %s1214_s7, 3072 }
 0x26f   : > { %p916_p10 = scmp.ne.s32.totalorder %s1151_s17, %s915_s10  ;;  %p920_p13 = scmp.lt.u32.totalorder %s1151_s17, %s1214_s7 }
 0x270   : > { %p921_p0 = scmp.lt.u32.totalorder %s919_s27, %s915_s10  ;;  %p923_p2 = scmp.lt.u32.totalorder %s915_s10, %s1151_s17 }
 0x271   : > { %p917_p11 = pnand %p916_p10, %p1091_p3 }
 0x272   : > { %p922_p1 = por %p921_p0, %p920_p13 }
 0x273   : > { %p918_p12 = pneg %p917_p11 }
 0x274   : > { %p924_p4 = por %p923_p2, %p922_p1 }
 0x276   : > { %p925_p5 = pnand %p924_p4, %p918_p12 }
 0x278   : > { %928 = shalt.err (!%p925_p5)
}
 0x279   : > { %s998_s2 = smov 128   ;;  %s999_s3 = smov 8  }
 0x27a   : > { %816 = dma.vmem_to_hbm [thread:$0]  (%p1091_p3), %s1153_s20, 256, %s1151_s17, %s1155_s9, %s998_s2, %s998_s2, %s999_s3  }
 0x27b PF: > { %p822_p6 = scmp.ge.s32.totalorder %s995_s8, 2  ;;  %s684_s22 = sand.u32 1, %s967_s24  }
 0x27c   : > { %s685_s23 = scalar_lea.sflag [#allocation3], %s684_s22 }
 0x27d   : > { %p819_p7 = pnand %p822_p6, %p1100_p8 }
 0x27f   : > { %962 = dma.done.wait (!%p819_p7), %s685_s23, 256  }
 0x280   : > { %964 = vsyncadd (!%p819_p7), %s685_s23, 4294967040  ;;  %s20_s8 = sadd.s32 1, %s995_s8   ;;  %s1221_s24 = smov %s971_s25 }
 0x281   : > { %p17_p9 = scmp.ge.s32.totalorder %s20_s8, 10   ;;  %s1222_s25 = smov %s975_s26 }
 0x282   : > { %s1223_s26 = smov %s1109_s19  ;;  %s1224_s27 = smov %s987_s29 }
 0x283   : > { %s1225_s28 = smov %s991_s30  ;;  %s1226_s29 = smov %s1229_s11 }
 0x284   : > { %s1227_s30 = smov %s1233_s12  ;;  %19 = sbr.rel (!%p17_p9) target bundleno = 8 (0x8), region = 86 }
 0x28b   :  { %690 = vsyncpa [#allocation3], 1 }
 0x28c   :  { %692 = vsyncpa [#allocation3 + $0x1], 1 }

</bundles_post_ra>
